<compile_context>
chip_gen: v5e
topology: v5e:2x2
jax: 0.10.0
libtpu: 0.0.40
codegen_flags: <defaults>
</compile_context>

<pallas_src>
import jax
import jax.numpy as jnp
from jax import lax
from jax.experimental import pallas as pl
from jax.experimental.pallas import tpu as pltpu


def _round_up(x: int, m: int) -> int:
    return ((x + m - 1) // m) * m


def _make_mlp_kernel(precision):
    def kernel(x_ref, w1_ref, b1_ref, w2_ref, b2_ref, o_ref):
        # fc1 on the MXU, f32 accumulation.  Cast x to the MXU input dtype
        # in-kernel (no-op for f32; avoids an HBM-side cast pass for bf16).
        x = x_ref[...].astype(w1_ref.dtype)
        h = jnp.dot(x, w1_ref[...],
                    preferred_element_type=jnp.float32, precision=precision)
        # Bias + ReLU in f32 on the VPU (valid on v5e too).
        h = jnp.maximum(h + b1_ref[...], 0.0)
        # fc2, again f32 accumulation on the MXU.
        y = jnp.dot(h.astype(w2_ref.dtype), w2_ref[...],
                    preferred_element_type=jnp.float32, precision=precision)
        o_ref[...] = (y + b2_ref[...]).astype(o_ref.dtype)
    return kernel


def prepare_params(w1, b1, w2, b2, *, matmul_dtype=jnp.bfloat16):
    """One-time parameter prep (do this once, reuse across calls).

    Weights are cast to the MXU input dtype (bf16 by default: native on the
    v5e/v6e/v7x MXU and halves weight HBM bytes; pass jnp.float32 for a
    bit-faithful f32 path).  Biases stay f32 as (1, n) rows — bias add + ReLU
    always run in f32 on the VPU.
    """
    return (jnp.asarray(w1, matmul_dtype),
            jnp.asarray(b1, jnp.float32).reshape(1, -1),
            jnp.asarray(w2, matmul_dtype),
            jnp.asarray(b2, jnp.float32).reshape(1, -1))


def motion_generator_forward(x, params, *, batch_tile=None, out_dtype=None):
    """x: (B, input_dim) activations; params: output of prepare_params.
    Returns (B, output_dim) in out_dtype (defaults to x.dtype)."""
    w1, b1, w2, b2 = params
    B, d_in = x.shape
    d_in_w, hidden = w1.shape
    hidden2, d_out = w2.shape
    assert d_in_w == d_in and hidden2 == hidden
    assert b1.shape == (1, hidden) and b2.shape == (1, d_out)
    if out_dtype is None:
        out_dtype = x.dtype

    # Batch tiling: sublane-aligned tile + cdiv grid with a partial tail block
    # (no row padding, no wasted tiles).  Default aims for >=2 grid steps so
    # the "parallel" axis can feed both v7x TensorCores / v6e megacore, capped
    # at 2048 rows (x tile 2048x32xf32 = 256 KB, out tile 512 KB — tiny).
    if batch_tile is None:
        batch_tile = min(2048, max(8, _round_up(pl.cdiv(B, 2), 8)))
    batch_tile = max(8, _round_up(min(batch_tile, _round_up(B, 8)), 8))
    grid = (pl.cdiv(B, batch_tile),)

    # Advisory cost estimate at the real problem size / actual dtypes.
    flops = 2 * B * hidden * (d_in + d_out)
    bytes_accessed = (x.size * x.dtype.itemsize
                      + w1.size * w1.dtype.itemsize
                      + w2.size * w2.dtype.itemsize
                      + (b1.size + b2.size) * 4
                      + B * d_out * jnp.dtype(out_dtype).itemsize)
    cost = pl.CostEstimate(flops=int(flops), transcendentals=0,
                           bytes_accessed=int(bytes_accessed))

    # Full-precision passes only matter for f32 MXU inputs.
    precision = (lax.Precision.HIGHEST
                 if jnp.dtype(w1.dtype) == jnp.dtype(jnp.float32) else None)

    return pl.pallas_call(
        _make_mlp_kernel(precision),
        out_shape=jax.ShapeDtypeStruct((B, d_out), out_dtype),
        grid_spec=pltpu.PrefetchScalarGridSpec(
            num_scalar_prefetch=0,
            grid=grid,
            in_specs=[
                # x: tiled on batch; last dim at its real (full-extent) width.
                pl.BlockSpec((batch_tile, d_in), lambda i: (i, 0)),
                # Weights / biases: resident (constant index_map).
                pl.BlockSpec((d_in, hidden), lambda i: (0, 0)),
                pl.BlockSpec((1, hidden), lambda i: (0, 0)),
                pl.BlockSpec((hidden, d_out), lambda i: (0, 0)),
                pl.BlockSpec((1, d_out), lambda i: (0, 0)),
            ],
            # Output written unpadded: masked vst on the 64-lane width, but
            # half the write bytes and no extra HBM slice pass.
            out_specs=pl.BlockSpec((batch_tile, d_out), lambda i: (i, 0)),
        ),
        compiler_params=pltpu.CompilerParams(
            dimension_semantics=("parallel",)),
        cost_estimate=cost,
    )(x, w1, b1, w2, b2)


def init_params(key, input_dim, output_dim, hidden=256, dtype=jnp.float32):
    """Deterministic synthetic init matching nn.Linear shapes (stored transposed)."""
    k1, k2, k3, k4 = jax.random.split(key, 4)
    bound1 = 1.0 / (input_dim ** 0.5)
    bound2 = 1.0 / (hidden ** 0.5)
    w1 = jax.random.uniform(k1, (input_dim, hidden), dtype, -bound1, bound1)
    b1 = jax.random.uniform(k2, (hidden,), dtype, -bound1, bound1)
    w2 = jax.random.uniform(k3, (hidden, output_dim), dtype, -bound2, bound2)
    b2 = jax.random.uniform(k4, (output_dim,), dtype, -bound2, bound2)
    return w1, b1, w2, b2


def _ref(x, w1, b1, w2, b2):
    h = jnp.maximum(jnp.dot(x, w1, precision=lax.Precision.HIGHEST) + b1, 0.0)
    return jnp.dot(h, w2, precision=lax.Precision.HIGHEST) + b2


if __name__ == "__main__":
    key = jax.random.PRNGKey(0)
    k_x, k_par, k_x2 = jax.random.split(key, 3)

    batch, input_dim, output_dim = 8, 32, 64   # audio-feature dim -> motion dim
    x = jax.random.normal(k_x, (batch, input_dim), jnp.float32)
    w1, b1, w2, b2 = init_params(k_par, input_dim, output_dim)
    ref = _ref(x, w1, b1, w2, b2)

    # 1) Default path: bf16 MXU inputs (native on v5e/v6e/v7x), f32 accumulate.
    params_bf16 = prepare_params(w1, b1, w2, b2)
    out = jax.block_until_ready(motion_generator_forward(x, params_bf16))
    assert out.shape == (batch, output_dim) and out.dtype == jnp.float32
    assert jnp.allclose(out, ref, atol=5e-2, rtol=5e-2)

    # 2) f32 path — faithful to the PyTorch module's f32 math.
    params_f32 = prepare_params(w1, b1, w2, b2, matmul_dtype=jnp.float32)
    out_f32 = jax.block_until_ready(motion_generator_forward(x, params_f32))
    assert jnp.allclose(out_f32, ref, atol=1e-4, rtol=1e-4)

    # 3) Non-divisible batch: partial boundary block, no padding, no slice.
    x_odd = jax.random.normal(k_x2, (10, input_dim), jnp.float32)
    out_odd = jax.block_until_ready(
        motion_generator_forward(x_odd, params_bf16))
    assert out_odd.shape == (10, output_dim)
    assert jnp.allclose(out_odd, _ref(x_odd, w1, b1, w2, b2),
                        atol=5e-2, rtol=5e-2)

    print("KERNEL_OK")
</pallas_src>

<mosaic_0001>
module attributes {stable_mosaic.version = 11 : i64} {
  func.func @kernel(%arg0: i32, %arg1: memref<8x32xf32, #tpu.memory_space<vmem>>, %arg2: memref<32x256xbf16, #tpu.memory_space<vmem>>, %arg3: memref<1x256xf32, #tpu.memory_space<vmem>>, %arg4: memref<256x64xbf16, #tpu.memory_space<vmem>>, %arg5: memref<1x64xf32, #tpu.memory_space<vmem>>, %arg6: memref<8x64xf32, #tpu.memory_space<vmem>>) attributes {dimension_semantics = [#tpu.dimension_semantics<parallel>], iteration_bounds = array<i64: 1>, scalar_prefetch = 0 : i64, scratch_operands = 0 : i64, tpu.core_type = #tpu.core_type<tc>, window_params = [{transform_indices = @transform_0, window_bounds = array<i64: 8, 32>}, {pipeline_mode = #tpu.pipeline_mode<synchronous>, transform_indices = @transform_1, window_bounds = array<i64: 32, 256>}, {pipeline_mode = #tpu.pipeline_mode<synchronous>, transform_indices = @transform_2, window_bounds = array<i64: 1, 256>}, {pipeline_mode = #tpu.pipeline_mode<synchronous>, transform_indices = @transform_3, window_bounds = array<i64: 256, 64>}, {pipeline_mode = #tpu.pipeline_mode<synchronous>, transform_indices = @transform_4, window_bounds = array<i64: 1, 64>}, {transform_indices = @transform_5, window_bounds = array<i64: 8, 64>}]} {
    %c0 = arith.constant 0 : index
    %c0_0 = arith.constant 0 : index
    %0 = vector.load %arg1[%c0, %c0_0] : memref<8x32xf32, #tpu.memory_space<vmem>>, vector<8x32xf32>
    %1 = arith.truncf %0 : vector<8x32xf32> to vector<8x32xbf16>
    %c0_1 = arith.constant 0 : index
    %c0_2 = arith.constant 0 : index
    %2 = vector.load %arg2[%c0_1, %c0_2] : memref<32x256xbf16, #tpu.memory_space<vmem>>, vector<32x256xbf16>
    %cst = arith.constant dense<0.000000e+00> : vector<8x256xf32>
    %3 = tpu.matmul %1, %2, %cst {dimension_numbers = #tpu.dot_dimension_numbers<[1], [0], [0], [1], [0, 0, 1, 1], [], []>} : vector<8x32xbf16>, vector<32x256xbf16>, vector<8x256xf32> -> vector<8x256xf32>
    %c0_3 = arith.constant 0 : index
    %c0_4 = arith.constant 0 : index
    %4 = vector.load %arg3[%c0_3, %c0_4] : memref<1x256xf32, #tpu.memory_space<vmem>>, vector<1x256xf32>
    %5 = vector.broadcast %4 : vector<1x256xf32> to vector<8x256xf32>
    %6 = arith.addf %3, %5 : vector<8x256xf32>
    %cst_5 = arith.constant 0.000000e+00 : f32
    %7 = vector.broadcast %cst_5 : f32 to vector<8x256xf32>
    %8 = arith.maximumf %6, %7 : vector<8x256xf32>
    %9 = arith.truncf %8 : vector<8x256xf32> to vector<8x256xbf16>
    %c0_6 = arith.constant 0 : index
    %c0_7 = arith.constant 0 : index
    %10 = vector.load %arg4[%c0_6, %c0_7] : memref<256x64xbf16, #tpu.memory_space<vmem>>, vector<256x64xbf16>
    %cst_8 = arith.constant dense<0.000000e+00> : vector<8x64xf32>
    %11 = tpu.matmul %9, %10, %cst_8 {dimension_numbers = #tpu.dot_dimension_numbers<[1], [0], [0], [1], [0, 0, 1, 1], [], []>} : vector<8x256xbf16>, vector<256x64xbf16>, vector<8x64xf32> -> vector<8x64xf32>
    %c0_9 = arith.constant 0 : index
    %c0_10 = arith.constant 0 : index
    %12 = vector.load %arg5[%c0_9, %c0_10] : memref<1x64xf32, #tpu.memory_space<vmem>>, vector<1x64xf32>
    %13 = vector.broadcast %12 : vector<1x64xf32> to vector<8x64xf32>
    %14 = arith.addf %11, %13 : vector<8x64xf32>
    %c0_11 = arith.constant 0 : index
    %c0_12 = arith.constant 0 : index
    %15 = vector.load %arg6[%c0_11, %c0_12] : memref<8x64xf32, #tpu.memory_space<vmem>>, vector<8x64xf32>
    tpu.vector_store %arg6[%c0_11, %c0_12], %14 {strides = array<i32>} : memref<8x64xf32, #tpu.memory_space<vmem>>, vector<8x64xf32>,
    return
  }
  func.func @transform_0(%arg0: i32) -> (i32, i32) {
    %c0_i32 = arith.constant 0 : i32
    %c0_i32_0 = arith.constant 0 : i32
    return %arg0, %c0_i32 : i32, i32
  }
  func.func @transform_1(%arg0: i32) -> (i32, i32) {
    %c0_i32 = arith.constant 0 : i32
    %c0_i32_0 = arith.constant 0 : i32
    %c0_i32_1 = arith.constant 0 : i32
    return %c0_i32, %c0_i32_0 : i32, i32
  }
  func.func @transform_2(%arg0: i32) -> (i32, i32) {
    %c0_i32 = arith.constant 0 : i32
    %c0_i32_0 = arith.constant 0 : i32
    %c0_i32_1 = arith.constant 0 : i32
    return %c0_i32, %c0_i32_0 : i32, i32
  }
  func.func @transform_3(%arg0: i32) -> (i32, i32) {
    %c0_i32 = arith.constant 0 : i32
    %c0_i32_0 = arith.constant 0 : i32
    %c0_i32_1 = arith.constant 0 : i32
    return %c0_i32, %c0_i32_0 : i32, i32
  }
  func.func @transform_4(%arg0: i32) -> (i32, i32) {
    %c0_i32 = arith.constant 0 : i32
    %c0_i32_0 = arith.constant 0 : i32
    %c0_i32_1 = arith.constant 0 : i32
    return %c0_i32, %c0_i32_0 : i32, i32
  }
  func.func @transform_5(%arg0: i32) -> (i32, i32) {
    %c0_i32 = arith.constant 0 : i32
    %c0_i32_0 = arith.constant 0 : i32
    return %arg0, %c0_i32 : i32, i32
  }
}

</mosaic_0001>

<bundles_post_ra>
// kernel: tpu_custom_call.1
= control target key start
LH: loop header
LB: loop body
LE: loop exit
PB: predicated region body
PF: predicated region fallthrough
CT: control target
= control target key end

     0   :  { %vm54_vm0 = vcmask 261120   ;;  %s509_s0 = inlined_call_operand.vmem [shape: f32[8,32], index: 0, kind: input, shape index: {}]   ;;  %s510_s1 = inlined_call_operand.vmem [shape: bf16[32,256], index: 1, kind: input, shape index: {}]   ;;  %s511_s2 = inlined_call_operand.vmem [shape: f32[1,256], index: 2, kind: input, shape index: {}]   ;;  %s512_s3 = inlined_call_operand.vmem [shape: bf16[256,64], index: 3, kind: input, shape index: {}]   ;;  %s513_s4 = inlined_call_operand.vmem [shape: f32[1,64], index: 4, kind: input, shape index: {}]   ;;  %s514_s5 = inlined_call_operand.hbm [shape: f32[8,64], index: 5, kind: output, shape index: {}]  }
   0x1   :  { %v274_v0 = vld [vmem:[%s510_s1 + $0x10] sm:$0xf]  ;;  %v349_v1 = vld [vmem:[%s510_s1 + $0x14] sm:$0xf0]  ;;  %v348_v2 = vld [vmem:[%s510_s1 + $0x14] sm:$0xf] }
   0x2   :  { %v275_v3 = vor.u32 %v349_v1, %v274_v0  ;;  %v276_v4 = vld [vmem:[%s510_s1 + $0x18] sm:$0xf0]  ;;  %v266_v5 = vld [vmem:[%s510_s1] sm:$0xf]  ;;  %v347_v6 = vld [vmem:[%s510_s1 + $0x4] sm:$0xf0] }
   0x3   :  { %v279_v7 = vor.u32 %v348_v2, %v276_v4  ;;  %v346_v8 = vld [vmem:[%s510_s1 + $0x4] sm:$0xf]  ;;  %v268_v9 = vld [vmem:[%s510_s1 + $0x8] sm:$0xf0]  ;;  %v267_v10 = vor.u32 %v347_v6, %v266_v5  ;;  %v357_v12 = vld [vmem:[%s512_s3 + $0x38] sm:$0xff] }
   0x4   :  { %64 = vmatpush.bf16.msra.mxu0 %v275_v3  ;;  %v22_v11 = vld [vmem:[%s509_s0] sm:$0xff]  ;;  %v365_v13 = vld [vmem:[%s512_s3 + $0x78] sm:$0xff]  ;;  %v271_v14 = vor.u32 %v346_v8, %v268_v9  ;;  %220 = vmatpush.bf16.msra.mxu2 %v357_v12  ;;  %v356_v15 = vld [vmem:[%s512_s3 + $0x30] sm:$0xff] }
   0x5   :  { %77 = vmatpush.bf16.msra.mxu1 %v279_v7  ;;  %233 = vmatpush.bf16.msra.mxu3 %v365_v13  ;;  %v364_v16 = vld [vmem:[%s512_s3 + $0x70] sm:$0xff]  ;;  %v23_v17 = vpack.c.bf16 %v22_v11, %v22_v11 }
   0x8   :  { %65 = vmatpush.bf16.msra.mxu0 %v267_v10 }
   0x9   :  { %10 = vsyncpa [#allocation3], 0  ;;  %78 = vmatpush.bf16.msra.mxu1 %v271_v14  ;;  %221 = vmatpush.bf16.msra.mxu2 %v356_v15  ;;  %v355_v18 = vld [vmem:[%s512_s3 + $0x28] sm:$0xff]  ;;  %v354_v20 = vld [vmem:[%s512_s3 + $0x20] sm:$0xff]  ;;  %s255_s20 = sshll.u32 %s514_s5, 4  ;;  %vm246_vm1 = vcmask 523264   ;;  %s256_s20 = int_to_ptr.hbm [resolvable:$true] %s255_s20 }
   0xa   :  { %234 = vmatpush.bf16.msra.mxu3 %v364_v16  ;;  %v363_v19 = vld [vmem:[%s512_s3 + $0x68] sm:$0xff]  ;;  %v362_v21 = vld [vmem:[%s512_s3 + $0x60] sm:$0xff]  ;;  %v353_v22 = vld [vmem:[%s512_s3 + $0x18] sm:$0xff] }
   0xb   :  { %280 = vmatmul.msk.bf16.vlgmr.msra.gmra.mxu0 %vm54_vm0, %v23_v17  ;;  %v361_v23 = vld [vmem:[%s512_s3 + $0x58] sm:$0xff]  ;;  %v352_v24 = vld [vmem:[%s512_s3 + $0x10] sm:$0xff]  ;;  %v351_v26 = vld [vmem:[%s512_s3 + $0x8] sm:$0xff] }
   0xc   :  { %281 = vmatmul.msk.bf16.vlgmr.msra.gmra.mxu1 %vm54_vm0, %v23_v17  ;;  %v360_v25 = vld [vmem:[%s512_s3 + $0x50] sm:$0xff]  ;;  %v359_v27 = vld [vmem:[%s512_s3 + $0x48] sm:$0xff]  ;;  %v350_v28 = vld [vmem:[%s512_s3] sm:$0xff] }
   0xd   :  { %222 = vmatpush.bf16.msra.mxu2 %v355_v18  ;;  %v358_v29 = vld [vmem:[%s512_s3 + $0x40] sm:$0xff] }
   0xe   :  { %235 = vmatpush.bf16.msra.mxu3 %v363_v19  ;;  %v28_v30 = vld [vmem:[%s511_s2] sm:$0x3]  ;;  %s394_s2 = smov [#allocation2]  }
   0xf   :  { %v30_v31 = vperm.slane %v28_v30, 0  ;;  %v31_v32 = vperm.slane %v28_v30, 1  ;;  %v367_v43 = vld [vmem:[%s513_s4] ss:$0 sm:$0xff]  ;;  %s253_s0 = sshll.u32 %s394_s2, 4  ;;  %s254_s0 = int_to_ptr.vmem [resolvable:$true] %s253_s0 }
  0x11   :  { %223 = vmatpush.bf16.msra.mxu2 %v354_v20 }
  0x12   :  { %236 = vmatpush.bf16.msra.mxu3 %v362_v21 }
  0x15   :  { %224 = vmatpush.bf16.msra.mxu2 %v353_v22 }
  0x16   :  { %237 = vmatpush.bf16.msra.mxu3 %v361_v23 }
  0x19   :  { %225 = vmatpush.bf16.msra.mxu2 %v352_v24 }
  0x1a   :  { %238 = vmatpush.bf16.msra.mxu3 %v360_v25 }
  0x1d   :  { %226 = vmatpush.bf16.msra.mxu2 %v351_v26 }
  0x1e   :  { %239 = vmatpush.bf16.msra.mxu3 %v359_v27 }
  0x21   :  { %227 = vmatpush.bf16.msra.mxu2 %v350_v28 }
  0x22   :  { %240 = vmatpush.bf16.msra.mxu3 %v358_v29 }
  0x88   :  { %v67_v33 = vpop.f32.mrf.mxu0 }
  0x89   :  { %v68_v34 = vadd.f32 %v67_v33, %v30_v31  ;;  %v80_v35 = vpop.f32.mrf.mxu1 }
  0x8a   :  { %v81_v36 = vadd.f32 %v80_v35, %v31_v32 }
  0x8b   :  { %v84_v37 = vmax.f32 %v68_v34, 0.0 }
  0x8c   :  { %v85_v38 = vmax.f32 %v81_v36, 0.0 }
  0x8d   :  { %v86_v39 = vpack.c.bf16 %v84_v37, %v84_v37 }
  0x8e   :  { %v87_v40 = vpack.c.bf16 %v85_v38, %v85_v38 }
  0x8f   :  { %228 = vmatmul.bf16.vlgmr.msra.gmra.mxu2 %v86_v39 }
  0x90   :  { %241 = vmatmul.bf16.vlgmr.msra.gmra.mxu3 %v87_v40  ;;  %v69_v41 = vpop.f32.mrf.mxu0 }
  0x91   :  { %v82_v42 = vpop.f32.mrf.mxu1 }
 0x112   :  { %v229_v44 = vpop.f32.mrf.mxu2 }
 0x113   :  { %v230_v45 = vadd.f32 %v367_v43, %v229_v44  ;;  %v242_v46 = vpop.f32.mrf.mxu3 }
 0x115   :  { %v243_v47 = vadd.f32 %v242_v46, %v230_v45 }
 0x117   :  { %247 = vst.msk [vmem:[#allocation2] sm:$0xff] %vm246_vm1, %v243_v47 }
 0x118   :  { %258 = dma.vmem_to_hbm [thread:$0]  %s254_s0, 128, %s256_s20, [#allocation3]  }
 0x11a   :  { %v231_v48 = vpop.f32.mrf.mxu2 }
 0x11b   :  { %v244_v49 = vpop.f32.mrf.mxu3 }
 0x11c   :  { %392 = dma.done.wait [#allocation3], 128  }
 0x11d   :  { %393 = vsyncadd [#allocation3], 4294967168 }
 0x11e   :  { %263 = vsyncpa [#allocation3], 1 }

</bundles_post_ra>
